<compile_context>
chip_gen: v5e
topology: v5e:2x2
jax: 0.10.0
libtpu: 0.0.40
codegen_flags: <defaults>
</compile_context>

<pallas_src>
import functools

import jax
import jax.numpy as jnp
from jax.experimental import pallas as pl
from jax.experimental.pallas import tpu as pltpu

_SUBLANE = 8  # slow (sublane) axis granule of a vreg


def _round_up(n, m):
    return ((n + m - 1) // m) * m


def _actor_kernel(x_ref,
                  w1_ref, b1_ref,
                  w2_ref, b2_ref,
                  w3_ref, b3_ref,
                  w4_ref, b4_ref,
                  o_ref):
    """Fused 4-layer MLP: relu(relu(relu(x@W1+b1)@W2+b2)@W3+b3)@W4+b4."""
    wd = w1_ref.dtype  # MXU input dtype (f32, or bf16 on v6e/v7x)
    h = x_ref[...].astype(wd)

    # fc1 + relu
    h = jnp.dot(h, w1_ref[...], preferred_element_type=jnp.float32)
    h = jnp.maximum(h + b1_ref[...], 0.0)

    # fc2 + relu
    h = jnp.dot(h.astype(wd), w2_ref[...], preferred_element_type=jnp.float32)
    h = jnp.maximum(h + b2_ref[...], 0.0)

    # fc3 + relu
    h = jnp.dot(h.astype(wd), w3_ref[...], preferred_element_type=jnp.float32)
    h = jnp.maximum(h + b3_ref[...], 0.0)

    # fc4 (no activation)
    h = jnp.dot(h.astype(wd), w4_ref[...], preferred_element_type=jnp.float32)
    o_ref[...] = (h + b4_ref[...]).astype(o_ref.dtype)


def prepare_actor_params(params, weight_dtype=jnp.float32):
    """One-time layout plumbing: optionally cast weights to bf16 (v6e/v7x).

    Biases stay f32 — they are added to the f32 MXU accumulator.  No shape
    padding is needed: every operand is passed with its natural shape.
    """
    out = {}
    for i in range(1, 5):
        out[f"w{i}"] = params[f"w{i}"].astype(weight_dtype)
        out[f"b{i}"] = params[f"b{i}"].astype(jnp.float32)
    return out


@functools.partial(jax.jit, static_argnames=("block_b",))
def actor_forward(x, params, *, block_b=2048):
    """Run the fused Actor MLP Pallas kernel.

    x:       (B, state_dim) float32
    params:  output of prepare_actor_params (w1..w4, b1..b4)
    block_b: batch-tile rows per grid step (rounded to a multiple of 8)
    """
    B, state_dim = x.shape
    w1, w2, w3, w4 = (params[k] for k in ("w1", "w2", "w3", "w4"))
    b1, b2, b3, b4 = (params[k] for k in ("b1", "b2", "b3", "b4"))
    h1 = w1.shape[1]
    h2 = w2.shape[1]
    h3 = w3.shape[1]
    action_dim = w4.shape[1]

    # ---- batch tiling -----------------------------------------------------
    b8 = _round_up(B, _SUBLANE)
    tb = min(_round_up(block_b, _SUBLANE), b8)
    # Keep at least 2 grid steps when the batch allows it, so the "parallel"
    # batch axis can be sharded across v7x's two TensorCores (harmless on
    # single-TC v5e/v6e).
    if b8 >= 2 * _SUBLANE:
        tb = min(tb, _round_up(pl.cdiv(b8, 2), _SUBLANE))
    bp = _round_up(B, tb)
    grid = (bp // tb,)

    # Pad the batch dim only when actually needed (avoids a full extra HBM
    # pass over the activations for the common B % tb == 0 case).
    x_in = x if bp == B else jnp.pad(x, ((0, bp - B), (0, 0)))

    def batch_map(i):      # x / output: march down the batch
        return (i, 0)

    def resident_map(i):   # weights / biases: same block every step -> stay in VMEM
        return (0, 0)

    operands = (x_in, w1, b1, w2, b2, w3, b3, w4, b4)
    in_specs = [
        pl.BlockSpec((tb, state_dim), batch_map),
        pl.BlockSpec((state_dim, h1), resident_map),
        pl.BlockSpec((1, h1), resident_map),
        pl.BlockSpec((h1, h2), resident_map),
        pl.BlockSpec((1, h2), resident_map),
        pl.BlockSpec((h2, h3), resident_map),
        pl.BlockSpec((1, h3), resident_map),
        pl.BlockSpec((h3, action_dim), resident_map),
        pl.BlockSpec((1, action_dim), resident_map),
    ]
    out_spec = pl.BlockSpec((tb, action_dim), batch_map)

    flops = 2 * bp * (state_dim * h1 + h1 * h2 + h2 * h3 + h3 * action_dim)
    param_bytes = sum(int(o.size) * o.dtype.itemsize for o in operands[1:])
    bytes_accessed = (bp * state_dim * x.dtype.itemsize
                      + param_bytes
                      + bp * action_dim * 4)

    out_padded = pl.pallas_call(
        _actor_kernel,
        out_shape=jax.ShapeDtypeStruct((bp, action_dim), jnp.float32),
        grid=grid,
        in_specs=in_specs,
        out_specs=out_spec,
        compiler_params=pltpu.CompilerParams(
            dimension_semantics=("parallel",)),
        cost_estimate=pl.CostEstimate(
            flops=flops, transcendentals=0, bytes_accessed=bytes_accessed),
    )(*operands)

    # Strip batch padding (no column padding exists anymore).
    return out_padded if bp == B else out_padded[:B]


def init_actor_params(key, state_dim, action_dim, hidden_dim=64):
    """Deterministic synthetic init (uniform like torch's default Linear init),
    weights stored as (in_features, out_features)."""
    dims = [
        (state_dim, hidden_dim),       # fc1
        (hidden_dim, hidden_dim * 2),  # fc2
        (hidden_dim * 2, hidden_dim),  # fc3
        (hidden_dim, action_dim),      # fc4
    ]
    params = {}
    for i, (fan_in, fan_out) in enumerate(dims, start=1):
        key, kw, kb = jax.random.split(key, 3)
        bound = 1.0 / (fan_in ** 0.5)
        params[f"w{i}"] = jax.random.uniform(
            kw, (fan_in, fan_out), jnp.float32, -bound, bound)
        params[f"b{i}"] = jax.random.uniform(
            kb, (1, fan_out), jnp.float32, -bound, bound)
    return params


def actor_reference(x, params):
    """Pure-JAX reference for correctness checking."""
    h = jnp.maximum(x @ params["w1"] + params["b1"], 0.0)
    h = jnp.maximum(h @ params["w2"] + params["b2"], 0.0)
    h = jnp.maximum(h @ params["w3"] + params["b3"], 0.0)
    return h @ params["w4"] + params["b4"]


if __name__ == "__main__":
    key = jax.random.PRNGKey(0)

    batch = 2
    state_dim = 8
    action_dim = 4
    hidden_dim = 32

    key, kx, kp = jax.random.split(key, 3)
    x = jax.random.normal(kx, (batch, state_dim), jnp.float32)
    params = init_actor_params(kp, state_dim, action_dim, hidden_dim)

    # f32 weights here so the 1e-5 parity check vs. the f32 reference holds.
    # On v6e/v7x use prepare_actor_params(params, jnp.bfloat16) and a looser
    # tolerance for halved weight-DMA / MXU operand bandwidth.
    kernel_params = prepare_actor_params(params, weight_dtype=jnp.float32)

    out = actor_forward(x, kernel_params)
    out = jax.block_until_ready(out)

    ref = actor_reference(x, params)
    assert out.shape == (batch, action_dim)
    assert jnp.allclose(out, ref, atol=1e-5, rtol=1e-5), "mismatch vs reference"

    print("KERNEL_OK")
</pallas_src>

<mosaic_0001>
module attributes {stable_mosaic.version = 11 : i64} {
  func.func @_actor_kernel(%arg0: i32, %arg1: memref<8x8xf32, #tpu.memory_space<vmem>>, %arg2: memref<8x32xf32, #tpu.memory_space<vmem>>, %arg3: memref<1x32xf32, #tpu.memory_space<vmem>>, %arg4: memref<32x64xf32, #tpu.memory_space<vmem>>, %arg5: memref<1x64xf32, #tpu.memory_space<vmem>>, %arg6: memref<64x32xf32, #tpu.memory_space<vmem>>, %arg7: memref<1x32xf32, #tpu.memory_space<vmem>>, %arg8: memref<32x4xf32, #tpu.memory_space<vmem>>, %arg9: memref<1x4xf32, #tpu.memory_space<vmem>>, %arg10: memref<8x4xf32, #tpu.memory_space<vmem>>) attributes {dimension_semantics = [#tpu.dimension_semantics<parallel>], iteration_bounds = array<i64: 1>, scalar_prefetch = 0 : i64, scratch_operands = 0 : i64, tpu.core_type = #tpu.core_type<tc>, window_params = [{transform_indices = @transform_0, window_bounds = array<i64: 8, 8>}, {pipeline_mode = #tpu.pipeline_mode<synchronous>, transform_indices = @transform_1, window_bounds = array<i64: 8, 32>}, {pipeline_mode = #tpu.pipeline_mode<synchronous>, transform_indices = @transform_2, window_bounds = array<i64: 1, 32>}, {pipeline_mode = #tpu.pipeline_mode<synchronous>, transform_indices = @transform_3, window_bounds = array<i64: 32, 64>}, {pipeline_mode = #tpu.pipeline_mode<synchronous>, transform_indices = @transform_4, window_bounds = array<i64: 1, 64>}, {pipeline_mode = #tpu.pipeline_mode<synchronous>, transform_indices = @transform_5, window_bounds = array<i64: 64, 32>}, {pipeline_mode = #tpu.pipeline_mode<synchronous>, transform_indices = @transform_6, window_bounds = array<i64: 1, 32>}, {pipeline_mode = #tpu.pipeline_mode<synchronous>, transform_indices = @transform_7, window_bounds = array<i64: 32, 4>}, {pipeline_mode = #tpu.pipeline_mode<synchronous>, transform_indices = @transform_8, window_bounds = array<i64: 1, 4>}, {transform_indices = @transform_9, window_bounds = array<i64: 8, 4>}]} {
    %c0 = arith.constant 0 : index
    %c0_0 = arith.constant 0 : index
    %0 = vector.load %arg1[%c0, %c0_0] : memref<8x8xf32, #tpu.memory_space<vmem>>, vector<8x8xf32>
    %c0_1 = arith.constant 0 : index
    %c0_2 = arith.constant 0 : index
    %1 = vector.load %arg2[%c0_1, %c0_2] : memref<8x32xf32, #tpu.memory_space<vmem>>, vector<8x32xf32>
    %cst = arith.constant dense<0.000000e+00> : vector<8x32xf32>
    %2 = tpu.matmul %0, %1, %cst {dimension_numbers = #tpu.dot_dimension_numbers<[1], [0], [0], [1], [0, 0, 1, 1], [], []>} : vector<8x8xf32>, vector<8x32xf32>, vector<8x32xf32> -> vector<8x32xf32>
    %c0_3 = arith.constant 0 : index
    %c0_4 = arith.constant 0 : index
    %3 = vector.load %arg3[%c0_3, %c0_4] : memref<1x32xf32, #tpu.memory_space<vmem>>, vector<1x32xf32>
    %4 = vector.broadcast %3 : vector<1x32xf32> to vector<8x32xf32>
    %5 = arith.addf %2, %4 : vector<8x32xf32>
    %cst_5 = arith.constant 0.000000e+00 : f32
    %6 = vector.broadcast %cst_5 : f32 to vector<8x32xf32>
    %7 = arith.maximumf %5, %6 : vector<8x32xf32>
    %c0_6 = arith.constant 0 : index
    %c0_7 = arith.constant 0 : index
    %8 = vector.load %arg4[%c0_6, %c0_7] : memref<32x64xf32, #tpu.memory_space<vmem>>, vector<32x64xf32>
    %cst_8 = arith.constant dense<0.000000e+00> : vector<8x64xf32>
    %9 = tpu.matmul %7, %8, %cst_8 {dimension_numbers = #tpu.dot_dimension_numbers<[1], [0], [0], [1], [0, 0, 1, 1], [], []>} : vector<8x32xf32>, vector<32x64xf32>, vector<8x64xf32> -> vector<8x64xf32>
    %c0_9 = arith.constant 0 : index
    %c0_10 = arith.constant 0 : index
    %10 = vector.load %arg5[%c0_9, %c0_10] : memref<1x64xf32, #tpu.memory_space<vmem>>, vector<1x64xf32>
    %11 = vector.broadcast %10 : vector<1x64xf32> to vector<8x64xf32>
    %12 = arith.addf %9, %11 : vector<8x64xf32>
    %cst_11 = arith.constant 0.000000e+00 : f32
    %13 = vector.broadcast %cst_11 : f32 to vector<8x64xf32>
    %14 = arith.maximumf %12, %13 : vector<8x64xf32>
    %c0_12 = arith.constant 0 : index
    %c0_13 = arith.constant 0 : index
    %15 = vector.load %arg6[%c0_12, %c0_13] : memref<64x32xf32, #tpu.memory_space<vmem>>, vector<64x32xf32>
    %cst_14 = arith.constant dense<0.000000e+00> : vector<8x32xf32>
    %16 = tpu.matmul %14, %15, %cst_14 {dimension_numbers = #tpu.dot_dimension_numbers<[1], [0], [0], [1], [0, 0, 1, 1], [], []>} : vector<8x64xf32>, vector<64x32xf32>, vector<8x32xf32> -> vector<8x32xf32>
    %c0_15 = arith.constant 0 : index
    %c0_16 = arith.constant 0 : index
    %17 = vector.load %arg7[%c0_15, %c0_16] : memref<1x32xf32, #tpu.memory_space<vmem>>, vector<1x32xf32>
    %18 = vector.broadcast %17 : vector<1x32xf32> to vector<8x32xf32>
    %19 = arith.addf %16, %18 : vector<8x32xf32>
    %cst_17 = arith.constant 0.000000e+00 : f32
    %20 = vector.broadcast %cst_17 : f32 to vector<8x32xf32>
    %21 = arith.maximumf %19, %20 : vector<8x32xf32>
    %c0_18 = arith.constant 0 : index
    %c0_19 = arith.constant 0 : index
    %22 = vector.load %arg8[%c0_18, %c0_19] : memref<32x4xf32, #tpu.memory_space<vmem>>, vector<32x4xf32>
    %cst_20 = arith.constant dense<0.000000e+00> : vector<8x4xf32>
    %23 = tpu.matmul %21, %22, %cst_20 {dimension_numbers = #tpu.dot_dimension_numbers<[1], [0], [0], [1], [0, 0, 1, 1], [], []>} : vector<8x32xf32>, vector<32x4xf32>, vector<8x4xf32> -> vector<8x4xf32>
    %c0_21 = arith.constant 0 : index
    %c0_22 = arith.constant 0 : index
    %24 = vector.load %arg9[%c0_21, %c0_22] : memref<1x4xf32, #tpu.memory_space<vmem>>, vector<1x4xf32>
    %25 = vector.broadcast %24 : vector<1x4xf32> to vector<8x4xf32>
    %26 = arith.addf %23, %25 : vector<8x4xf32>
    %c0_23 = arith.constant 0 : index
    %c0_24 = arith.constant 0 : index
    %27 = vector.load %arg10[%c0_23, %c0_24] : memref<8x4xf32, #tpu.memory_space<vmem>>, vector<8x4xf32>
    tpu.vector_store %arg10[%c0_23, %c0_24], %26 {strides = array<i32>} : memref<8x4xf32, #tpu.memory_space<vmem>>, vector<8x4xf32>,
    return
  }
  func.func @transform_0(%arg0: i32) -> (i32, i32) {
    %c0_i32 = arith.constant 0 : i32
    %c0_i32_0 = arith.constant 0 : i32
    return %arg0, %c0_i32 : i32, i32
  }
  func.func @transform_1(%arg0: i32) -> (i32, i32) {
    %c0_i32 = arith.constant 0 : i32
    %c0_i32_0 = arith.constant 0 : i32
    %c0_i32_1 = arith.constant 0 : i32
    return %c0_i32, %c0_i32_0 : i32, i32
  }
  func.func @transform_2(%arg0: i32) -> (i32, i32) {
    %c0_i32 = arith.constant 0 : i32
    %c0_i32_0 = arith.constant 0 : i32
    %c0_i32_1 = arith.constant 0 : i32
    return %c0_i32, %c0_i32_0 : i32, i32
  }
  func.func @transform_3(%arg0: i32) -> (i32, i32) {
    %c0_i32 = arith.constant 0 : i32
    %c0_i32_0 = arith.constant 0 : i32
    %c0_i32_1 = arith.constant 0 : i32
    return %c0_i32, %c0_i32_0 : i32, i32
  }
  func.func @transform_4(%arg0: i32) -> (i32, i32) {
    %c0_i32 = arith.constant 0 : i32
    %c0_i32_0 = arith.constant 0 : i32
    %c0_i32_1 = arith.constant 0 : i32
    return %c0_i32, %c0_i32_0 : i32, i32
  }
  func.func @transform_5(%arg0: i32) -> (i32, i32) {
    %c0_i32 = arith.constant 0 : i32
    %c0_i32_0 = arith.constant 0 : i32
    %c0_i32_1 = arith.constant 0 : i32
    return %c0_i32, %c0_i32_0 : i32, i32
  }
  func.func @transform_6(%arg0: i32) -> (i32, i32) {
    %c0_i32 = arith.constant 0 : i32
    %c0_i32_0 = arith.constant 0 : i32
    %c0_i32_1 = arith.constant 0 : i32
    return %c0_i32, %c0_i32_0 : i32, i32
  }
  func.func @transform_7(%arg0: i32) -> (i32, i32) {
    %c0_i32 = arith.constant 0 : i32
    %c0_i32_0 = arith.constant 0 : i32
    %c0_i32_1 = arith.constant 0 : i32
    return %c0_i32, %c0_i32_0 : i32, i32
  }
  func.func @transform_8(%arg0: i32) -> (i32, i32) {
    %c0_i32 = arith.constant 0 : i32
    %c0_i32_0 = arith.constant 0 : i32
    %c0_i32_1 = arith.constant 0 : i32
    return %c0_i32, %c0_i32_0 : i32, i32
  }
  func.func @transform_9(%arg0: i32) -> (i32, i32) {
    %c0_i32 = arith.constant 0 : i32
    %c0_i32_0 = arith.constant 0 : i32
    return %arg0, %c0_i32 : i32, i32
  }
}

</mosaic_0001>

<bundles_post_ra>
// kernel: actor_forward.1
= control target key start
LH: loop header
LB: loop body
LE: loop exit
PB: predicated region body
PF: predicated region fallthrough
CT: control target
= control target key end

     0   :  { %vm38_vm0 = vcmask 64512   ;;  %vm71_vm1 = vcmask 261120   ;;  %vm108_vm2 = vcmask 523264   ;;  %vm164_vm3 = vcmask 31744   ;;  %s299_s1 = inlined_call_operand.vmem [shape: f32[8,32], index: 1, kind: input, shape index: {}]   ;;  %s300_s0 = inlined_call_operand.vmem [shape: f32[8,8], index: 0, kind: input, shape index: {}]   ;;  %s301_s3 = inlined_call_operand.vmem [shape: f32[32,64], index: 3, kind: input, shape index: {}]   ;;  %s302_s2 = inlined_call_operand.vmem [shape: f32[1,32], index: 2, kind: input, shape index: {}]   ;;  %s303_s4 = inlined_call_operand.vmem [shape: f32[1,64], index: 4, kind: input, shape index: {}]   ;;  %s304_s5 = inlined_call_operand.vmem [shape: f32[64,32], index: 5, kind: input, shape index: {}]   ;;  %s305_s6 = inlined_call_operand.vmem [shape: f32[1,32], index: 6, kind: input, shape index: {}]   ;;  %s306_s7 = inlined_call_operand.vmem [shape: f32[32,4], index: 7, kind: input, shape index: {}]   ;;  %s307_s8 = inlined_call_operand.vmem [shape: f32[1,4], index: 8, kind: input, shape index: {}]   ;;  %s308_s9 = inlined_call_operand.vmem [shape: f32[8,4], index: 9, kind: output, shape index: {}]  }
   0x1   :  { %v33_v0 = vld [vmem:[%s299_s1] sm:$0xff]  ;;  %v66_v2 = vld [vmem:[%s301_s3 + $0x18] sm:$0xff]  ;;  %v65_v3 = vld [vmem:[%s301_s3 + $0x10] sm:$0xff] }
   0x2   :  { %v32_v1 = vld [vmem:[%s300_s0] sm:$0xff]  ;;  %57 = vmatpush.msra.mxu0 %v33_v0  ;;  %87 = vmatpush.msra.mxu1 %v66_v2  ;;  %v64_v4 = vld [vmem:[%s301_s3 + $0x8] sm:$0xff]  ;;  %v103_v6 = vld [vmem:[%s304_s5 + $0x38] sm:$0xff] }
   0x3   :  { %170 = vmatmul.msk.f32.vlgmr.msra.gmra.mxu0 %vm38_vm0, %v32_v1  ;;  %v63_v5 = vld [vmem:[%s301_s3] sm:$0xff]  ;;  %v102_v7 = vld [vmem:[%s304_s5 + $0x30] sm:$0xff]  ;;  %120 = vmatpush.msra.mxu2 %v103_v6  ;;  %v101_v8 = vld [vmem:[%s304_s5 + $0x28] sm:$0xff] }
   0x4   :  { %88 = vmatpush.msra.mxu1 %v65_v3  ;;  %v100_v9 = vld [vmem:[%s304_s5 + $0x20] sm:$0xff]  ;;  %v99_v10 = vld [vmem:[%s304_s5 + $0x18] sm:$0xff]  ;;  %v98_v15 = vld [vmem:[%s304_s5 + $0x10] sm:$0xff] }
   0x5   :  { %121 = vmatpush.msra.mxu2 %v102_v7  ;;  %v174_v11 = vld [vmem:[%s302_s2] ss:$0 sm:$0xff]  ;;  %v97_v16 = vld [vmem:[%s304_s5 + $0x8] sm:$0xff]  ;;  %v136_v18 = vld [vmem:[%s306_s7 + $0x18] sm:$0xff] }
   0x6   :  { %89 = vmatpush.msra.mxu1 %v64_v4  ;;  %v96_v17 = vld [vmem:[%s304_s5] sm:$0xff]  ;;  %156 = vmatpush.msra.mxu3 %v136_v18  ;;  %v135_v23 = vld [vmem:[%s306_s7 + $0x10] sm:$0xff]  ;;  %v134_v24 = vld [vmem:[%s306_s7 + $0x8] sm:$0xff] }
   0x7   :  { %122 = vmatpush.msra.mxu2 %v101_v8  ;;  %v175_v19 = vld [vmem:[%s303_s4] ss:$0 sm:$0xff] }
   0x8   :  { %90 = vmatpush.msra.mxu1 %v63_v5  ;;  %157 = vmatpush.msra.mxu3 %v135_v23  ;;  %v133_v25 = vld [vmem:[%s306_s7] sm:$0xff] }
   0x9   :  { %123 = vmatpush.msra.mxu2 %v100_v9  ;;  %v176_v26 = vld [vmem:[%s305_s6] ss:$0 sm:$0xff] }
   0xa   :  { %158 = vmatpush.msra.mxu3 %v134_v24  ;;  %v177_v30 = vld [vmem:[%s307_s8] ss:$0 sm:$0xff] }
   0xb   :  { %124 = vmatpush.msra.mxu2 %v99_v10 }
   0xc   :  { %159 = vmatpush.msra.mxu3 %v133_v25 }
   0xd   :  { %125 = vmatpush.msra.mxu2 %v98_v15 }
   0xf   :  { %126 = vmatpush.msra.mxu2 %v97_v16 }
  0x11   :  { %127 = vmatpush.msra.mxu2 %v96_v17 }
  0x80   :  { %v59_v12 = vpop.f32.mrf.mxu0 }
  0x81   :  { %v60_v13 = vadd.f32 %v174_v11, %v59_v12 }
  0x83   :  { %v62_v14 = vmax.f32 %v60_v13, 0.0 }
  0x85   :  { %171 = vmatmul.msk.f32.vlgmr.msra.gmra.mxu1 %vm71_vm1, %v62_v14 }
 0x102   :  { %v92_v20 = vpop.f32.mrf.mxu1 }
 0x103   :  { %v93_v21 = vadd.f32 %v175_v19, %v92_v20 }
 0x105   :  { %v95_v22 = vmax.f32 %v93_v21, 0.0 }
 0x107   :  { %172 = vmatmul.msk.f32.vlgmr.msra.gmra.mxu2 %vm108_vm2, %v95_v22 }
 0x18a   :  { %v129_v27 = vpop.f32.mrf.mxu2 }
 0x18b   :  { %v130_v28 = vadd.f32 %v176_v26, %v129_v27 }
 0x18d   :  { %v132_v29 = vmax.f32 %v130_v28, 0.0 }
 0x18f   :  { %173 = vmatmul.msk.f32.vlgmr.msra.gmra.mxu3 %vm71_vm1, %v132_v29 }
 0x212   :  { %v161_v31 = vpop.f32.mrf.mxu3 }
 0x213   :  { %v162_v32 = vadd.f32 %v177_v30, %v161_v31 }
 0x215   :  { %165 = vst.msk [vmem:[%s308_s9] sm:$0xff] %vm164_vm3, %v162_v32 }

</bundles_post_ra>
